<compile_context>
chip_gen: v7x
topology: tpu7x:2x2x1
jax: 0.10.0
libtpu: 0.0.40
codegen_flags: <defaults>
</compile_context>

<pallas_src>
import jax
import jax.numpy as jnp
from jax.experimental import pallas as pl
from jax.experimental.pallas import tpu as pltpu


def _softmax_regression_kernel(x_ref, w_ref, b_ref, o_ref):
    # score = x @ W + b  (MXU matmul, f32 accumulation; b is (1, C) and
    # broadcasts over the rows of the batch tile).
    score = jnp.dot(x_ref[...], w_ref[...], preferred_element_type=jnp.float32)
    score = score + b_ref[...]

    # Numerically-stable softmax along the class (last / lane) axis.  Padded
    # class columns (if any) carry a -1e30 bias, so exp(score - max) is exactly
    # 0 for them and the denominator is unaffected.
    m = jnp.max(score, axis=-1, keepdims=True)
    e = jnp.exp(score - m)
    denom = jnp.sum(e, axis=-1, keepdims=True)
    # Exact division: rows sum to 1 to f32 precision (matches torch.softmax);
    # the VALU cost is hidden under the memory-bound pipeline.
    o_ref[...] = (e / denom).astype(o_ref.dtype)


def _round_up(v, m):
    return ((v + m - 1) // m) * m


def _vmem_budget_bytes():
    """Generation-aware VMEM budget for the pallas_call."""
    phys = 128 * 1024 * 1024
    try:
        phys = int(pltpu.get_tpu_info().vmem_capacity_bytes)
    except Exception:
        pass
    if phys <= 64 * 1024 * 1024:
        return 44 * 1024 * 1024   # v7x: 64 MiB physical per TensorCore
    return 80 * 1024 * 1024       # v5e / v6e: 128 MiB physical


def model_sr_forward(x, W, b, *, compute_dtype=None, max_tile_rows=2048):
    """Pallas implementation of ModelSR.forward.

    x: [N, input_dim] float32
    W: [input_dim, output_dim] float32
    b: [output_dim] float32
    compute_dtype: optional dtype (e.g. jnp.bfloat16) for the matmul operands;
                   accumulation stays f32.  Default None keeps f32 parity with
                   PyTorch.
    returns: [N, output_dim] float32 softmax probabilities.
    """
    N, D = x.shape
    Dw, C = W.shape
    assert D == Dw, "input_dim mismatch between x and W"

    # --- class dimension handling -------------------------------------------
    # Lane-dense padding (multiple of 128) only pays off for larger C; for
    # small C the unpadded output block avoids 8x-inflated HBM writes and the
    # wrapper slice copy.  (Pre-padding W/b once at parameter setup — or under
    # jit where they are constants — removes the per-call pad entirely.)
    if C % 128 == 0 or C <= 64:
        C_out = C
        W_p, b_p = W, b
    else:
        C_out = _round_up(C, 128)
        W_p = jnp.pad(W, ((0, 0), (0, C_out - C)))
        # Huge negative bias on padded classes -> softmax prob exactly 0.
        b_p = jnp.pad(b, (0, C_out - C), constant_values=-1e30)
    b2 = b_p.reshape(1, C_out).astype(jnp.float32)

    if compute_dtype is not None:
        x_in = x.astype(compute_dtype)
        W_in = W_p.astype(compute_dtype)
    else:
        x_in = x
        W_in = W_p

    x_itemsize = jnp.dtype(x_in.dtype).itemsize
    w_itemsize = jnp.dtype(W_in.dtype).itemsize
    # Packed dtypes fill 16/32 sublanes per vreg.
    sublane = max(8, 32 // x_itemsize)

    # --- VMEM-budget-derived batch tiling ------------------------------------
    budget = _vmem_budget_bytes()
    w_resident_bytes = D * C_out * w_itemsize + C_out * 4   # single-buffered
    per_row_bytes = 2 * (D * x_itemsize + C_out * 4)        # x + out, double-buffered
    avail = budget - w_resident_bytes - (2 << 20)           # slack for compiler scratch
    tile_rows = max(0, avail) // per_row_bytes
    if tile_rows < sublane:
        # TODO(synk): add a K-tiled (input_dim) grid axis with a VMEM f32
        # accumulator (pl.when init/finalize) when W does not fit VMEM-resident.
        tile_rows = sublane
    tile_rows = min(tile_rows, max_tile_rows)

    # v7x has 2 TensorCores: give the "parallel" batch axis >= 2 grid steps
    # whenever there is enough work for two tiles.
    if N > 2 * sublane:
        tile_rows = min(tile_rows, _round_up((N + 1) // 2, 256))

    # MXU/sublane-friendly rounding.
    if tile_rows >= 256:
        tile_rows = (tile_rows // 256) * 256
    else:
        tile_rows = (tile_rows // sublane) * sublane
    tile_rows = max(sublane, min(tile_rows, _round_up(N, sublane)))

    grid = (pl.cdiv(N, tile_rows),)

    cost = pl.CostEstimate(
        flops=2 * N * D * C_out,
        transcendentals=N * C_out,  # exp
        bytes_accessed=(N * D * x_itemsize        # x
                        + D * C_out * w_itemsize  # W (resident, read once)
                        + C_out * 4               # b
                        + N * C_out * 4),         # output
    )

    def _weight_specs(single_buffer):
        if single_buffer:
            try:
                return (
                    pl.BlockSpec((D, C_out), lambda i: (0, 0),
                                 pipeline_mode=pl.Buffered(1)),
                    pl.BlockSpec((1, C_out), lambda i: (0, 0),
                                 pipeline_mode=pl.Buffered(1)),
                )
            except TypeError:
                pass  # older JAX without pipeline_mode on BlockSpec
        return (
            pl.BlockSpec((D, C_out), lambda i: (0, 0)),
            pl.BlockSpec((1, C_out), lambda i: (0, 0)),
        )

    def _run(single_buffer_weights):
        w_spec, b_spec = _weight_specs(single_buffer_weights)
        return pl.pallas_call(
            _softmax_regression_kernel,
            out_shape=jax.ShapeDtypeStruct((N, C_out), jnp.float32),
            grid=grid,
            in_specs=[
                # x: one batch tile per grid step (pipelined / double-buffered)
                pl.BlockSpec((tile_rows, D), lambda i: (i, 0)),
                # W, b: constant index_map -> stay resident in VMEM
                w_spec,
                b_spec,
            ],
            out_specs=pl.BlockSpec((tile_rows, C_out), lambda i: (i, 0)),
            compiler_params=pltpu.CompilerParams(
                # batch rows are independent -> shard across TCs on v7x
                dimension_semantics=("parallel",),
                vmem_limit_bytes=budget,
            ),
            cost_estimate=cost,
        )(x_in, W_in, b2)

    try:
        out_full = _run(True)
    except Exception:
        # Compatibility fallback if Buffered(1) resident-weight hint is rejected.
        out_full = _run(False)

    if C_out != C:
        return out_full[:, :C]
    return out_full


if __name__ == "__main__":
    # Small shapes consistent with the module: N samples, input_dim features,
    # output_dim classes.
    N, input_dim, output_dim = 8, 32, 16

    key = jax.random.PRNGKey(0)
    kx, kw, kb = jax.random.split(key, 3)

    x = jax.random.normal(kx, (N, input_dim), dtype=jnp.float32)
    # ModelSR.__init__ uses zeros; deterministic small random params exercise
    # the full compute path instead.
    W = 0.1 * jax.random.normal(kw, (input_dim, output_dim), dtype=jnp.float32)
    b = 0.1 * jax.random.normal(kb, (output_dim,), dtype=jnp.float32)

    out = model_sr_forward(x, W, b)
    out = jax.block_until_ready(out)

    ref = jax.nn.softmax(x @ W + b, axis=1)
    assert out.shape == (N, output_dim)
    assert jnp.allclose(out, ref, atol=2e-3, rtol=1e-2), "mismatch vs reference"
    # Exact division -> rows sum to 1 to f32 precision.
    assert jnp.allclose(jnp.sum(out, axis=1), jnp.ones((N,)), atol=1e-4), \
        "rows must sum to 1"

    # Also exercise the lane-dense padded-class path (C > 64, not a multiple
    # of 128) to validate the -1e30 padded-bias handling.
    N2, D2, C2 = 16, 32, 72
    k2x, k2w, k2b = jax.random.split(jax.random.PRNGKey(1), 3)
    x2 = jax.random.normal(k2x, (N2, D2), dtype=jnp.float32)
    W2 = 0.1 * jax.random.normal(k2w, (D2, C2), dtype=jnp.float32)
    b2v = 0.1 * jax.random.normal(k2b, (C2,), dtype=jnp.float32)
    out2 = jax.block_until_ready(model_sr_forward(x2, W2, b2v))
    ref2 = jax.nn.softmax(x2 @ W2 + b2v, axis=1)
    assert out2.shape == (N2, C2)
    assert jnp.allclose(out2, ref2, atol=2e-3, rtol=1e-2), "padded-path mismatch"
    assert jnp.allclose(jnp.sum(out2, axis=1), jnp.ones((N2,)), atol=1e-4)

    print("KERNEL_OK")
</pallas_src>

<mosaic_0001>
module attributes {stable_mosaic.version = 11 : i64} {
  func.func @_softmax_regression_kernel(%arg0: i32, %arg1: memref<8x32xf32, #tpu.memory_space<vmem>>, %arg2: memref<32x16xf32, #tpu.memory_space<vmem>>, %arg3: memref<1x16xf32, #tpu.memory_space<vmem>>, %arg4: memref<8x16xf32, #tpu.memory_space<vmem>>) attributes {dimension_semantics = [#tpu.dimension_semantics<parallel>], iteration_bounds = array<i64: 1>, scalar_prefetch = 0 : i64, scratch_operands = 0 : i64, tpu.core_type = #tpu.core_type<tc>, window_params = [{transform_indices = @transform_0, window_bounds = array<i64: 8, 32>}, {pipeline_mode = #tpu.pipeline_mode<synchronous>, transform_indices = @transform_1, window_bounds = array<i64: 32, 16>}, {pipeline_mode = #tpu.pipeline_mode<synchronous>, transform_indices = @transform_2, window_bounds = array<i64: 1, 16>}, {transform_indices = @transform_3, window_bounds = array<i64: 8, 16>}]} {
    %c0 = arith.constant 0 : index
    %c0_0 = arith.constant 0 : index
    %0 = vector.load %arg1[%c0, %c0_0] : memref<8x32xf32, #tpu.memory_space<vmem>>, vector<8x32xf32>
    %c0_1 = arith.constant 0 : index
    %c0_2 = arith.constant 0 : index
    %1 = vector.load %arg2[%c0_1, %c0_2] : memref<32x16xf32, #tpu.memory_space<vmem>>, vector<32x16xf32>
    %cst = arith.constant dense<0.000000e+00> : vector<8x16xf32>
    %2 = tpu.matmul %0, %1, %cst {dimension_numbers = #tpu.dot_dimension_numbers<[1], [0], [0], [1], [0, 0, 1, 1], [], []>} : vector<8x32xf32>, vector<32x16xf32>, vector<8x16xf32> -> vector<8x16xf32>
    %c0_3 = arith.constant 0 : index
    %c0_4 = arith.constant 0 : index
    %3 = vector.load %arg3[%c0_3, %c0_4] : memref<1x16xf32, #tpu.memory_space<vmem>>, vector<1x16xf32>
    %4 = vector.broadcast %3 : vector<1x16xf32> to vector<8x16xf32>
    %5 = arith.addf %2, %4 : vector<8x16xf32>
    %cst_5 = arith.constant dense<0xFF800000> : vector<8xf32>
    %6 = vector.multi_reduction <maximumf>, %5, %cst_5 [1] : vector<8x16xf32> to vector<8xf32>
    %7 = vector.shape_cast %6 : vector<8xf32> to vector<8x1xf32>
    %8 = vector.broadcast %7 : vector<8x1xf32> to vector<8x16xf32>
    %9 = arith.subf %5, %8 : vector<8x16xf32>
    %10 = math.exp %9 : vector<8x16xf32>
    %cst_6 = arith.constant dense<0.000000e+00> : vector<8xf32>
    %11 = vector.multi_reduction <add>, %10, %cst_6 [1] : vector<8x16xf32> to vector<8xf32>
    %12 = vector.shape_cast %11 : vector<8xf32> to vector<8x1xf32>
    %13 = vector.broadcast %12 : vector<8x1xf32> to vector<8x16xf32>
    %14 = arith.divf %10, %13 : vector<8x16xf32>
    %c0_7 = arith.constant 0 : index
    %c0_8 = arith.constant 0 : index
    %15 = vector.load %arg4[%c0_7, %c0_8] : memref<8x16xf32, #tpu.memory_space<vmem>>, vector<8x16xf32>
    tpu.vector_store %arg4[%c0_7, %c0_8], %14 {strides = array<i32>} : memref<8x16xf32, #tpu.memory_space<vmem>>, vector<8x16xf32>,
    return
  }
  func.func @transform_0(%arg0: i32) -> (i32, i32) {
    %c0_i32 = arith.constant 0 : i32
    %c0_i32_0 = arith.constant 0 : i32
    return %arg0, %c0_i32 : i32, i32
  }
  func.func @transform_1(%arg0: i32) -> (i32, i32) {
    %c0_i32 = arith.constant 0 : i32
    %c0_i32_0 = arith.constant 0 : i32
    %c0_i32_1 = arith.constant 0 : i32
    return %c0_i32, %c0_i32_0 : i32, i32
  }
  func.func @transform_2(%arg0: i32) -> (i32, i32) {
    %c0_i32 = arith.constant 0 : i32
    %c0_i32_0 = arith.constant 0 : i32
    %c0_i32_1 = arith.constant 0 : i32
    return %c0_i32, %c0_i32_0 : i32, i32
  }
  func.func @transform_3(%arg0: i32) -> (i32, i32) {
    %c0_i32 = arith.constant 0 : i32
    %c0_i32_0 = arith.constant 0 : i32
    return %arg0, %c0_i32 : i32, i32
  }
}

module attributes {stable_mosaic.version = 11 : i64} {
  func.func @_softmax_regression_kernel(%arg0: i32, %arg1: memref<8x32xf32, #tpu.memory_space<vmem>>, %arg2: memref<32x16xf32, #tpu.memory_space<vmem>>, %arg3: memref<1x16xf32, #tpu.memory_space<vmem>>, %arg4: memref<8x16xf32, #tpu.memory_space<vmem>>) attributes {dimension_semantics = [#tpu.dimension_semantics<parallel>], iteration_bounds = array<i64: 1>, scalar_prefetch = 0 : i64, scratch_operands = 0 : i64, tpu.core_type = #tpu.core_type<tc>, window_params = [{transform_indices = @transform_0, window_bounds = array<i64: 8, 32>}, {pipeline_mode = #tpu.pipeline_mode<synchronous>, transform_indices = @transform_1, window_bounds = array<i64: 32, 16>}, {pipeline_mode = #tpu.pipeline_mode<synchronous>, transform_indices = @transform_2, window_bounds = array<i64: 1, 16>}, {transform_indices = @transform_3, window_bounds = array<i64: 8, 16>}]} {
    %c0 = arith.constant 0 : index
    %c0_0 = arith.constant 0 : index
    %0 = vector.load %arg1[%c0, %c0_0] : memref<8x32xf32, #tpu.memory_space<vmem>>, vector<8x32xf32>
    %c0_1 = arith.constant 0 : index
    %c0_2 = arith.constant 0 : index
    %1 = vector.load %arg2[%c0_1, %c0_2] : memref<32x16xf32, #tpu.memory_space<vmem>>, vector<32x16xf32>
    %cst = arith.constant dense<0.000000e+00> : vector<8x16xf32>
    %2 = tpu.matmul %0, %1, %cst {dimension_numbers = #tpu.dot_dimension_numbers<[1], [0], [0], [1], [0, 0, 1, 1], [], []>} : vector<8x32xf32>, vector<32x16xf32>, vector<8x16xf32> -> vector<8x16xf32>
    %c0_3 = arith.constant 0 : index
    %c0_4 = arith.constant 0 : index
    %3 = vector.load %arg3[%c0_3, %c0_4] : memref<1x16xf32, #tpu.memory_space<vmem>>, vector<1x16xf32>
    %4 = vector.broadcast %3 : vector<1x16xf32> to vector<8x16xf32>
    %5 = arith.addf %2, %4 : vector<8x16xf32>
    %cst_5 = arith.constant dense<0xFF800000> : vector<8xf32>
    %6 = vector.multi_reduction <maximumf>, %5, %cst_5 [1] : vector<8x16xf32> to vector<8xf32>
    %7 = vector.shape_cast %6 : vector<8xf32> to vector<8x1xf32>
    %8 = vector.broadcast %7 : vector<8x1xf32> to vector<8x16xf32>
    %9 = arith.subf %5, %8 : vector<8x16xf32>
    %10 = math.exp %9 : vector<8x16xf32>
    %cst_6 = arith.constant dense<0.000000e+00> : vector<8xf32>
    %11 = vector.multi_reduction <add>, %10, %cst_6 [1] : vector<8x16xf32> to vector<8xf32>
    %12 = vector.shape_cast %11 : vector<8xf32> to vector<8x1xf32>
    %13 = vector.broadcast %12 : vector<8x1xf32> to vector<8x16xf32>
    %14 = arith.divf %10, %13 : vector<8x16xf32>
    %c0_7 = arith.constant 0 : index
    %c0_8 = arith.constant 0 : index
    %15 = vector.load %arg4[%c0_7, %c0_8] : memref<8x16xf32, #tpu.memory_space<vmem>>, vector<8x16xf32>
    tpu.vector_store %arg4[%c0_7, %c0_8], %14 {strides = array<i32>} : memref<8x16xf32, #tpu.memory_space<vmem>>, vector<8x16xf32>,
    return
  }
  func.func @transform_0(%arg0: i32) -> (i32, i32) {
    %c0_i32 = arith.constant 0 : i32
    %c0_i32_0 = arith.constant 0 : i32
    return %arg0, %c0_i32 : i32, i32
  }
  func.func @transform_1(%arg0: i32) -> (i32, i32) {
    %c0_i32 = arith.constant 0 : i32
    %c0_i32_0 = arith.constant 0 : i32
    %c0_i32_1 = arith.constant 0 : i32
    return %c0_i32, %c0_i32_0 : i32, i32
  }
  func.func @transform_2(%arg0: i32) -> (i32, i32) {
    %c0_i32 = arith.constant 0 : i32
    %c0_i32_0 = arith.constant 0 : i32
    %c0_i32_1 = arith.constant 0 : i32
    return %c0_i32, %c0_i32_0 : i32, i32
  }
  func.func @transform_3(%arg0: i32) -> (i32, i32) {
    %c0_i32 = arith.constant 0 : i32
    %c0_i32_0 = arith.constant 0 : i32
    return %arg0, %c0_i32 : i32, i32
  }
}

</mosaic_0001>

<bundles_post_ra>
// kernel: tpu_custom_call.1
= control target key start
LH: loop header
LB: loop body
LE: loop exit
PB: predicated region body
PF: predicated region fallthrough
CT: control target
= control target key end

     0   :  { %8 = vsyncpa [#allocation3], 0  ;;  %s378_s0 = inlined_call_operand.hbm [shape: f32[8,32], index: 0, kind: input, shape index: {}]   ;;  %s379_s1 = inlined_call_operand.hbm [shape: f32[32,16], index: 1, kind: input, shape index: {}]   ;;  %s380_s2 = inlined_call_operand.hbm [shape: f32[1,16], index: 2, kind: input, shape index: {}]   ;;  %s381_s3 = inlined_call_operand.hbm [shape: f32[8,16], index: 3, kind: output, shape index: {}]  }
   0x1   :  { %9 = vsyncpa [#allocation6], 0 }
   0x2   :  { %10 = vsyncpa [#allocation4], 0  ;;  %s298_s12 = smov [#allocation5]   ;;  %s204_s16 = scalar_lea.hbm %s379_s1, 512 }
   0x3   :  { %s26_s13 = sshll.u32 %s298_s12, 4  ;;  %p205_p0 = scmp.ne.s32.totalorder %s379_s1, %s204_s16  ;;  %s27_s13 = int_to_ptr.vmem [resolvable:$true] %s26_s13 }
   0x4   :  { %p208_p1 = scmp.lt.u32.totalorder %s204_s16, %s379_s1 }
   0x6   :  { %p210_p2 = pnand %p208_p1, %p205_p0 }
   0x8   :  { %213 = shalt.err (!%p210_p2)
}
   0x9   :  { %s214_s21 = scalar_lea.vmem %s27_s13, 512  ;;  %p219_p4 = scmp.lt.s32.totalorder %s27_s13, %s27_s13 }
   0xa   :  { %p215_p3 = scmp.ne.s32.totalorder %s27_s13, %s214_s21  ;;  %p220_p5 = scmp.lt.s32.totalorder %s214_s21, %s214_s21 }
   0xc   :  { %p221_p6 = por %p220_p5, %p219_p4 }
   0xe   :  { %p222_p7 = pnand %p221_p6, %p215_p3 }
  0x10   :  { %225 = shalt.err (!%p222_p7)
}
  0x11   :  { %s299_s22 = smov 128   ;;  %s300_s23 = smov 8  }
  0x12   :  { %32 = dma.hbm_to_vmem [thread:$0]  %s379_s1, 512, %s27_s13, [#allocation6], %s299_s22, %s299_s22, %s300_s23  }
  0x13   :  { %s301_s26 = smov [#allocation2]   ;;  %s302_s28 = smov [#allocation7]  }
  0x14   :  { %s17_s27 = sshll.u32 %s301_s26, 4  ;;  %s39_s29 = sshll.u32 %s302_s28, 4  ;;  %s18_s27 = int_to_ptr.vmem [resolvable:$true] %s17_s27  ;;  %s40_s29 = int_to_ptr.vmem [resolvable:$true] %s39_s29 }
  0x15   :  { %s226_s5 = scalar_lea.hbm %s378_s0, 128 }
  0x16   :  { %p227_p8 = scmp.ne.s32.totalorder %s378_s0, %s226_s5  ;;  %p230_p9 = scmp.lt.u32.totalorder %s226_s5, %s378_s0 }
  0x18   :  { %p232_p10 = pnand %p230_p9, %p227_p8 }
  0x1a   :  { %235 = shalt.err (!%p232_p10)
}
  0x1b   :  { %s236_s1 = scalar_lea.vmem %s18_s27, 128  ;;  %p241_p12 = scmp.lt.s32.totalorder %s18_s27, %s18_s27 }
  0x1c   :  { %p237_p11 = scmp.ne.s32.totalorder %s18_s27, %s236_s1  ;;  %p242_p13 = scmp.lt.s32.totalorder %s236_s1, %s236_s1 }
  0x1e   :  { %p243_p0 = por %p242_p13, %p241_p12 }
  0x20   :  { %p244_p1 = pnand %p243_p0, %p237_p11 }
  0x22   :  { %247 = shalt.err (!%p244_p1)
}
  0x23   :  { %20 = dma.hbm_to_vmem [thread:$0]  %s378_s0, 128, %s18_s27, [#allocation3]  }
  0x24   :  { %s248_s14 = scalar_lea.hbm %s380_s2, 16 }
  0x25   :  { %p249_p2 = scmp.ne.s32.totalorder %s380_s2, %s248_s14  ;;  %p252_p3 = scmp.lt.u32.totalorder %s248_s14, %s380_s2 }
  0x27   :  { %p254_p4 = pnand %p252_p3, %p249_p2 }
  0x29   :  { %257 = shalt.err (!%p254_p4)
}
  0x2a   :  { %s258_s19 = scalar_lea.vmem %s40_s29, 16  ;;  %s262_s20 = scalar_lea.vmem %s40_s29, 32 }
  0x2b   :  { %p259_p5 = scmp.ne.s32.totalorder %s40_s29, %s258_s19  ;;  %p263_p6 = scmp.lt.s32.totalorder %s40_s29, %s40_s29 }
  0x2c   :  { %p264_p7 = scmp.lt.s32.totalorder %s262_s20, %s258_s19 }
  0x2e   :  { %p265_p8 = por %p264_p7, %p263_p6 }
  0x30   :  { %p266_p9 = pnand %p265_p8, %p259_p5 }
  0x32   :  { %269 = shalt.err (!%p266_p9)
}
  0x33   :  { %42 = dma.hbm_to_vmem [thread:$0]  %s380_s2, 16, %s40_s29, [#allocation6]  }
  0x34   :  { %292 = dma.done.wait [#allocation3], 128  }
  0x35   :  { %293 = vsyncadd [#allocation3], 4294967168 }
  0x36   :  { %294 = dma.done.wait [#allocation6], 528  }
  0x37   :  { %295 = vsyncadd [#allocation6], 4294966768  ;;  %v303_v0 = vmov 0.0|0.0   ;;  %vm304_vm0 = vmmov 0   ;;  %v305_v1 = vmov 0.0   ;;  %v53_v2 = vld [vmem:[#allocation5] sm:$0xff] }
  0x38   :  { %185 = vmatprep.subr.bf16.mxu0 %v303_v0  ;;  %182 = vmatprep.mubr.msk.f32.mxu0 %vm304_vm0, %v305_v1  ;;  %v54_v3 = vld [vmem:[#allocation5 + $0x8] sm:$0xff]  ;;  %v55_v4 = vld [vmem:[#allocation5 + $0x10] sm:$0xff]  ;;  %v56_v6 = vld [vmem:[#allocation5 + $0x18] sm:$0xff]  ;;  %vm64_vm1 = vcmask 261120   ;;  %vm138_vm2 = vcmask 130048   ;;  %s306_s2 = smov [#allocation8]  }
  0x39   :  { %v186_v5 = vpack.c.bf16 %v54_v3, %v53_v2  ;;  %v189_v7 = vpack.c.bf16 %v56_v6, %v55_v4  ;;  %v52_v8 = vld [vmem:[#allocation2] sm:$0xff]  ;;  %v167_v9 = vld [vmem:[#allocation7] ss:$0 sm:$0xff]  ;;  %s157_s22 = sshll.u32 %s306_s2, 4  ;;  %s158_s22 = int_to_ptr.vmem [resolvable:$true] %s157_s22 }
  0x3a   :  { %s270_s23 = scalar_lea.vmem %s158_s22, 128  ;;  %p275_p11 = scmp.lt.s32.totalorder %s158_s22, %s158_s22 }
  0x3b   :  { %187 = vmatpush3.bf16.msra.mxu0 %v186_v5  ;;  %p271_p10 = scmp.ne.s32.totalorder %s158_s22, %s270_s23  ;;  %p276_p12 = scmp.lt.s32.totalorder %s270_s23, %s270_s23 }
  0x3c   :  { %188 = vmatprep.subr.bf16.mxu0 %v303_v0 }
  0x3d   :  { %p277_p13 = por %p276_p12, %p275_p11 }
  0x3f   :  { %190 = vmatpush3.bf16.msra.mxu0 %v189_v7  ;;  %p278_p0 = pnand %p277_p13, %p271_p10 }
  0x42   :  { %183 = vmatmul.mubr.msk.f32.vlgmr.msra.gmra.mrb[0].mxu0 %vm64_vm1, %v52_v8 }
 0x115   :  { %v134_v10 = vpop.f32.mrb[0].mxu0 }
 0x116   :  { %v135_v11 = vadd.f32 %v167_v9, %v134_v10  ;;  %v184_v12 = vpop.f32.mrb[1].mxu0 }
 0x118   :  { %v139_v13 = vsel %vm138_vm2, %v135_v11, -inf }
 0x119   :  { %140 = vmax.xlane.f32.xlu0 %v139_v13 }
 0x1a6   :  { %v141_v14 = vpop.xlane.xlu0 %140 }
 0x1a7   :  { %v142_v15 = vsub.f32 %v135_v11, %v141_v14 }
 0x1a9   :  { %v143_v16 = vmul.f32 1.442695, %v142_v15 }
 0x1ab   :  { %200 = vpow2.f32 %v143_v16 }
 0x1b5   :  { %v201_v17 = vpop.eup %200 }
 0x1b6   :  { %v145_v18 = vsel %vm138_vm2, %v201_v17, 0.0 }
 0x1b7   :  { %146 = vadd.xlane.f32.xlu0 %v145_v18 }
 0x244   :  { %v147_v19 = vpop.xlane.xlu0 %146 }
 0x245   :  { %202 = vrcp.f32 %v147_v19 }
 0x24f   :  { %v203_v20 = vpop.eup %202 }
 0x250   :  { %v149_v21 = vmul.f32 %v203_v20, %v201_v17 }
 0x252   :  { %150 = vst.msk [vmem:[#allocation8] sm:$0xff] %vm138_vm2, %v149_v21 }
 0x253   :  { %281 = shalt.err (!%p278_p0)
}
 0x254   :  { %s282_s26 = scalar_lea.hbm %s381_s3, 128 }
 0x255   :  { %p283_p1 = scmp.ne.s32.totalorder %s381_s3, %s282_s26  ;;  %p286_p2 = scmp.lt.u32.totalorder %s282_s26, %s381_s3 }
 0x257   :  { %p288_p3 = pnand %p286_p2, %p283_p1 }
 0x259   :  { %291 = shalt.err (!%p288_p3)
}
 0x25a   :  { %160 = dma.vmem_to_hbm [thread:$0]  %s158_s22, 128, %s381_s3, [#allocation4]  }
 0x25b   :  { %296 = dma.done.wait [#allocation4], 128  }
 0x25c   :  { %297 = vsyncadd [#allocation4], 4294967168 }
 0x25d   :  { %164 = vsyncpa [#allocation3], 1 }
 0x25e   :  { %165 = vsyncpa [#allocation6], 1 }
 0x25f   :  { %166 = vsyncpa [#allocation4], 1 }

// kernel: tpu_custom_call.1
= control target key start
LH: loop header
LB: loop body
LE: loop exit
PB: predicated region body
PF: predicated region fallthrough
CT: control target
= control target key end

     0   :  { %8 = vsyncpa [#allocation3], 0  ;;  %s378_s0 = inlined_call_operand.hbm [shape: f32[8,32], index: 0, kind: input, shape index: {}]   ;;  %s379_s1 = inlined_call_operand.hbm [shape: f32[32,16], index: 1, kind: input, shape index: {}]   ;;  %s380_s2 = inlined_call_operand.hbm [shape: f32[1,16], index: 2, kind: input, shape index: {}]   ;;  %s381_s3 = inlined_call_operand.hbm [shape: f32[8,16], index: 3, kind: output, shape index: {}]  }
   0x1   :  { %9 = vsyncpa [#allocation6], 0 }
   0x2   :  { %10 = vsyncpa [#allocation4], 0  ;;  %s298_s12 = smov [#allocation5]   ;;  %s204_s16 = scalar_lea.hbm %s379_s1, 512 }
   0x3   :  { %s26_s13 = sshll.u32 %s298_s12, 4  ;;  %p205_p0 = scmp.ne.s32.totalorder %s379_s1, %s204_s16  ;;  %s27_s13 = int_to_ptr.vmem [resolvable:$true] %s26_s13 }
   0x4   :  { %p208_p1 = scmp.lt.u32.totalorder %s204_s16, %s379_s1 }
   0x6   :  { %p210_p2 = pnand %p208_p1, %p205_p0 }
   0x8   :  { %213 = shalt.err (!%p210_p2)
}
   0x9   :  { %s214_s21 = scalar_lea.vmem %s27_s13, 512  ;;  %p219_p4 = scmp.lt.s32.totalorder %s27_s13, %s27_s13 }
   0xa   :  { %p215_p3 = scmp.ne.s32.totalorder %s27_s13, %s214_s21  ;;  %p220_p5 = scmp.lt.s32.totalorder %s214_s21, %s214_s21 }
   0xc   :  { %p221_p6 = por %p220_p5, %p219_p4 }
   0xe   :  { %p222_p7 = pnand %p221_p6, %p215_p3 }
  0x10   :  { %225 = shalt.err (!%p222_p7)
}
  0x11   :  { %s299_s22 = smov 128   ;;  %s300_s23 = smov 8  }
  0x12   :  { %32 = dma.hbm_to_vmem [thread:$0]  %s379_s1, 512, %s27_s13, [#allocation6], %s299_s22, %s299_s22, %s300_s23  }
  0x13   :  { %s301_s26 = smov [#allocation2]   ;;  %s302_s28 = smov [#allocation7]  }
  0x14   :  { %s17_s27 = sshll.u32 %s301_s26, 4  ;;  %s39_s29 = sshll.u32 %s302_s28, 4  ;;  %s18_s27 = int_to_ptr.vmem [resolvable:$true] %s17_s27  ;;  %s40_s29 = int_to_ptr.vmem [resolvable:$true] %s39_s29 }
  0x15   :  { %s226_s5 = scalar_lea.hbm %s378_s0, 128 }
  0x16   :  { %p227_p8 = scmp.ne.s32.totalorder %s378_s0, %s226_s5  ;;  %p230_p9 = scmp.lt.u32.totalorder %s226_s5, %s378_s0 }
  0x18   :  { %p232_p10 = pnand %p230_p9, %p227_p8 }
  0x1a   :  { %235 = shalt.err (!%p232_p10)
}
  0x1b   :  { %s236_s1 = scalar_lea.vmem %s18_s27, 128  ;;  %p241_p12 = scmp.lt.s32.totalorder %s18_s27, %s18_s27 }
  0x1c   :  { %p237_p11 = scmp.ne.s32.totalorder %s18_s27, %s236_s1  ;;  %p242_p13 = scmp.lt.s32.totalorder %s236_s1, %s236_s1 }
  0x1e   :  { %p243_p0 = por %p242_p13, %p241_p12 }
  0x20   :  { %p244_p1 = pnand %p243_p0, %p237_p11 }
  0x22   :  { %247 = shalt.err (!%p244_p1)
}
  0x23   :  { %20 = dma.hbm_to_vmem [thread:$0]  %s378_s0, 128, %s18_s27, [#allocation3]  }
  0x24   :  { %s248_s14 = scalar_lea.hbm %s380_s2, 16 }
  0x25   :  { %p249_p2 = scmp.ne.s32.totalorder %s380_s2, %s248_s14  ;;  %p252_p3 = scmp.lt.u32.totalorder %s248_s14, %s380_s2 }
  0x27   :  { %p254_p4 = pnand %p252_p3, %p249_p2 }
  0x29   :  { %257 = shalt.err (!%p254_p4)
}
  0x2a   :  { %s258_s19 = scalar_lea.vmem %s40_s29, 16  ;;  %s262_s20 = scalar_lea.vmem %s40_s29, 32 }
  0x2b   :  { %p259_p5 = scmp.ne.s32.totalorder %s40_s29, %s258_s19  ;;  %p263_p6 = scmp.lt.s32.totalorder %s40_s29, %s40_s29 }
  0x2c   :  { %p264_p7 = scmp.lt.s32.totalorder %s262_s20, %s258_s19 }
  0x2e   :  { %p265_p8 = por %p264_p7, %p263_p6 }
  0x30   :  { %p266_p9 = pnand %p265_p8, %p259_p5 }
  0x32   :  { %269 = shalt.err (!%p266_p9)
}
  0x33   :  { %42 = dma.hbm_to_vmem [thread:$0]  %s380_s2, 16, %s40_s29, [#allocation6]  }
  0x34   :  { %292 = dma.done.wait [#allocation3], 128  }
  0x35   :  { %293 = vsyncadd [#allocation3], 4294967168 }
  0x36   :  { %294 = dma.done.wait [#allocation6], 528  }
  0x37   :  { %295 = vsyncadd [#allocation6], 4294966768  ;;  %v303_v0 = vmov 0.0|0.0   ;;  %vm304_vm0 = vmmov 0   ;;  %v305_v1 = vmov 0.0   ;;  %v53_v2 = vld [vmem:[#allocation5] sm:$0xff] }
  0x38   :  { %185 = vmatprep.subr.bf16.mxu0 %v303_v0  ;;  %182 = vmatprep.mubr.msk.f32.mxu0 %vm304_vm0, %v305_v1  ;;  %v54_v3 = vld [vmem:[#allocation5 + $0x8] sm:$0xff]  ;;  %v55_v4 = vld [vmem:[#allocation5 + $0x10] sm:$0xff]  ;;  %v56_v6 = vld [vmem:[#allocation5 + $0x18] sm:$0xff]  ;;  %vm64_vm1 = vcmask 261120   ;;  %vm138_vm2 = vcmask 130048   ;;  %s306_s2 = smov [#allocation8]  }
  0x39   :  { %v186_v5 = vpack.c.bf16 %v54_v3, %v53_v2  ;;  %v189_v7 = vpack.c.bf16 %v56_v6, %v55_v4  ;;  %v52_v8 = vld [vmem:[#allocation2] sm:$0xff]  ;;  %v167_v9 = vld [vmem:[#allocation7] ss:$0 sm:$0xff]  ;;  %s157_s22 = sshll.u32 %s306_s2, 4  ;;  %s158_s22 = int_to_ptr.vmem [resolvable:$true] %s157_s22 }
  0x3a   :  { %s270_s23 = scalar_lea.vmem %s158_s22, 128  ;;  %p275_p11 = scmp.lt.s32.totalorder %s158_s22, %s158_s22 }
  0x3b   :  { %187 = vmatpush3.bf16.msra.mxu0 %v186_v5  ;;  %p271_p10 = scmp.ne.s32.totalorder %s158_s22, %s270_s23  ;;  %p276_p12 = scmp.lt.s32.totalorder %s270_s23, %s270_s23 }
  0x3c   :  { %188 = vmatprep.subr.bf16.mxu0 %v303_v0 }
  0x3d   :  { %p277_p13 = por %p276_p12, %p275_p11 }
  0x3f   :  { %190 = vmatpush3.bf16.msra.mxu0 %v189_v7  ;;  %p278_p0 = pnand %p277_p13, %p271_p10 }
  0x42   :  { %183 = vmatmul.mubr.msk.f32.vlgmr.msra.gmra.mrb[0].mxu0 %vm64_vm1, %v52_v8 }
 0x115   :  { %v134_v10 = vpop.f32.mrb[0].mxu0 }
 0x116   :  { %v135_v11 = vadd.f32 %v167_v9, %v134_v10  ;;  %v184_v12 = vpop.f32.mrb[1].mxu0 }
 0x118   :  { %v139_v13 = vsel %vm138_vm2, %v135_v11, -inf }
 0x119   :  { %140 = vmax.xlane.f32.xlu0 %v139_v13 }
 0x1a6   :  { %v141_v14 = vpop.xlane.xlu0 %140 }
 0x1a7   :  { %v142_v15 = vsub.f32 %v135_v11, %v141_v14 }
 0x1a9   :  { %v143_v16 = vmul.f32 1.442695, %v142_v15 }
 0x1ab   :  { %200 = vpow2.f32 %v143_v16 }
 0x1b5   :  { %v201_v17 = vpop.eup %200 }
 0x1b6   :  { %v145_v18 = vsel %vm138_vm2, %v201_v17, 0.0 }
 0x1b7   :  { %146 = vadd.xlane.f32.xlu0 %v145_v18 }
 0x244   :  { %v147_v19 = vpop.xlane.xlu0 %146 }
 0x245   :  { %202 = vrcp.f32 %v147_v19 }
 0x24f   :  { %v203_v20 = vpop.eup %202 }
 0x250   :  { %v149_v21 = vmul.f32 %v203_v20, %v201_v17 }
 0x252   :  { %150 = vst.msk [vmem:[#allocation8] sm:$0xff] %vm138_vm2, %v149_v21 }
 0x253   :  { %281 = shalt.err (!%p278_p0)
}
 0x254   :  { %s282_s26 = scalar_lea.hbm %s381_s3, 128 }
 0x255   :  { %p283_p1 = scmp.ne.s32.totalorder %s381_s3, %s282_s26  ;;  %p286_p2 = scmp.lt.u32.totalorder %s282_s26, %s381_s3 }
 0x257   :  { %p288_p3 = pnand %p286_p2, %p283_p1 }
 0x259   :  { %291 = shalt.err (!%p288_p3)
}
 0x25a   :  { %160 = dma.vmem_to_hbm [thread:$0]  %s158_s22, 128, %s381_s3, [#allocation4]  }
 0x25b   :  { %296 = dma.done.wait [#allocation4], 128  }
 0x25c   :  { %297 = vsyncadd [#allocation4], 4294967168 }
 0x25d   :  { %164 = vsyncpa [#allocation3], 1 }
 0x25e   :  { %165 = vsyncpa [#allocation6], 1 }
 0x25f   :  { %166 = vsyncpa [#allocation4], 1 }

</bundles_post_ra>
